<compile_context>
chip_gen: v7x
topology: tpu7x:2x2x1
jax: 0.10.0
libtpu: 0.0.40
codegen_flags: <defaults>
</compile_context>

<pallas_src>
import functools

import jax
import jax.numpy as jnp
import numpy as np
from jax.experimental import pallas as pl
from jax.experimental.pallas import tpu as pltpu

_VMEM_LIMIT = 48 * 1024 * 1024          # scoped VMEM limit (safe on v5e/v6e/v7x)
_CHUNK_VMEM_BUDGET = 12 * 1024 * 1024   # budget for the recurrence's pipelined chunk buffers


# --------------------------------------------------------------------------- helpers
def _round_up(n, m):
    return ((n + m - 1) // m) * m


def _pick_row_tile(n_rows, target=512):
    """Row tile for the projection matmuls: whole (8-padded) thing if small, else 512 rows."""
    return min(target, _round_up(n_rows, 8))


def _choose_t_chunk(T, B, H, budget_bytes=_CHUNK_VMEM_BUDGET):
    """Largest divisor of T whose double-buffered chunk buffers fit the VMEM budget."""
    def chunk_bytes(tc):
        gi = 2 * tc * B * 4 * H * 2      # fw + bw gi chunks, bf16
        out = 2 * tc * B * H * 4         # fw + bw hidden outputs, f32
        return 2 * (gi + out)            # double-buffered
    best = 1
    for tc in range(1, T + 1):
        if T % tc == 0 and chunk_bytes(tc) <= budget_bytes:
            best = tc
    return best


# ------------------------------------------------------- input-projection kernels (hoisted)
def _proj1_kernel(x_ref, wf_ref, wb_ref, bf_ref, bb_ref, of_ref, ob_ref):
    """Layer 0: gi_fw = X @ Wih_fw + b_fw ; gi_bw = X @ Wih_bw + b_bw (bf16 in, f32 acc, bf16 out)."""
    x = x_ref[...]
    of_ref[...] = (jnp.dot(x, wf_ref[...], preferred_element_type=jnp.float32)
                   + bf_ref[...]).astype(of_ref.dtype)
    ob_ref[...] = (jnp.dot(x, wb_ref[...], preferred_element_type=jnp.float32)
                   + bb_ref[...]).astype(ob_ref.dtype)


def _proj2_kernel(xf_ref, xb_ref, wff_ref, wbf_ref, wfb_ref, wbb_ref,
                  bf_ref, bb_ref, of_ref, ob_ref):
    """Layers > 0: input is concat(fw_prev, bw_prev); uses split W_ih halves (no concat)."""
    xf = xf_ref[...]
    xb = xb_ref[...]
    of_ref[...] = (jnp.dot(xf, wff_ref[...], preferred_element_type=jnp.float32)
                   + jnp.dot(xb, wbf_ref[...], preferred_element_type=jnp.float32)
                   + bf_ref[...]).astype(of_ref.dtype)
    ob_ref[...] = (jnp.dot(xf, wfb_ref[...], preferred_element_type=jnp.float32)
                   + jnp.dot(xb, wbb_ref[...], preferred_element_type=jnp.float32)
                   + bb_ref[...]).astype(ob_ref.dtype)


def _input_projection_first(x2d, wf, wb, bf, bb):
    TB, Din = x2d.shape
    G = wf.shape[1]  # 4H
    rm = _pick_row_tile(TB)
    pad = (-TB) % rm
    xp = jnp.pad(x2d, ((0, pad), (0, 0))) if pad else x2d
    TBp = TB + pad
    grid = (TBp // rm,)
    row_spec = pl.BlockSpec((rm, Din), lambda i: (i, 0))
    w_spec = pl.BlockSpec((Din, G), lambda i: (0, 0))
    b_spec = pl.BlockSpec((1, G), lambda i: (0, 0))
    out_spec = pl.BlockSpec((rm, G), lambda i: (i, 0))
    of, ob = pl.pallas_call(
        _proj1_kernel,
        grid=grid,
        in_specs=[row_spec, w_spec, w_spec, b_spec, b_spec],
        out_specs=(out_spec, out_spec),
        out_shape=(jax.ShapeDtypeStruct((TBp, G), jnp.bfloat16),
                   jax.ShapeDtypeStruct((TBp, G), jnp.bfloat16)),
        compiler_params=pltpu.CompilerParams(
            dimension_semantics=("parallel",),
            vmem_limit_bytes=_VMEM_LIMIT),
    )(xp, wf, wb, bf, bb)
    return of[:TB], ob[:TB]


def _input_projection_deep(f2d, b2d, wff, wbf, wfb, wbb, bf, bb):
    TB, H = f2d.shape
    G = wff.shape[1]  # 4H
    rm = _pick_row_tile(TB)
    pad = (-TB) % rm
    if pad:
        f2d = jnp.pad(f2d, ((0, pad), (0, 0)))
        b2d = jnp.pad(b2d, ((0, pad), (0, 0)))
    TBp = TB + pad
    grid = (TBp // rm,)
    row_spec = pl.BlockSpec((rm, H), lambda i: (i, 0))
    w_spec = pl.BlockSpec((H, G), lambda i: (0, 0))
    b_spec = pl.BlockSpec((1, G), lambda i: (0, 0))
    out_spec = pl.BlockSpec((rm, G), lambda i: (i, 0))
    of, ob = pl.pallas_call(
        _proj2_kernel,
        grid=grid,
        in_specs=[row_spec, row_spec, w_spec, w_spec, w_spec, w_spec, b_spec, b_spec],
        out_specs=(out_spec, out_spec),
        out_shape=(jax.ShapeDtypeStruct((TBp, G), jnp.bfloat16),
                   jax.ShapeDtypeStruct((TBp, G), jnp.bfloat16)),
        compiler_params=pltpu.CompilerParams(
            dimension_semantics=("parallel",),
            vmem_limit_bytes=_VMEM_LIMIT),
    )(f2d, b2d, wff, wbf, wfb, wbb, bf, bb)
    return of[:TB], ob[:TB]


# ---------------------------------------------- fused bidirectional recurrence kernel
def _bilstm_rec_kernel(gif_ref, gib_ref, w_ref, of_ref, ob_ref, hpad, c_scr, *, unroll):
    """One time-chunk of the fused forward+backward LSTM recurrence.

    gif_ref : (Tc, B, 4H) bf16  precomputed x@Wih+b for the forward chunk (time-ordered,
                                 i/f/o gate columns pre-scaled by 0.5)
    gib_ref : (Tc, B, 4H) bf16  same for the backward chunk
    w_ref   : (2H, 4H)    bf16  stacked [Whh_fw ; Whh_bw] (i/f/o columns pre-scaled by 0.5)
    of/ob   : (Tc, B, H)  f32   hidden outputs, time-aligned to original indices
    hpad    : (2B, 2H)    f32   scratch: rows 0:B hold h_fw in cols 0:H, rows B:2B hold
                                h_bw in cols H:2H, zeros elsewhere (block-diag via padding)
    c_scr   : (2B, H)     f32   scratch: stacked cell state [c_fw ; c_bw]
    """
    chunk = pl.program_id(0)

    @pl.when(chunk == 0)
    def _():
        hpad[...] = jnp.zeros_like(hpad)
        c_scr[...] = jnp.zeros_like(c_scr)

    Tc, B, G = gif_ref.shape
    H = G // 4
    w = w_ref[...]

    def step(j, carry):
        jb = Tc - 1 - j  # backward direction: reversed local time within the chunk

        # ONE MXU issue for both directions: (2B,2H) @ (2H,4H) -> (2B,4H), f32 acc.
        hw = jnp.dot(hpad[...].astype(jnp.bfloat16), w,
                     preferred_element_type=jnp.float32)

        gates = jnp.concatenate([gif_ref[j], gib_ref[jb]],
                                axis=0).astype(jnp.float32) + hw      # (2B, 4H)

        # ONE wide EUP push: i/f/o columns were pre-scaled by 0.5, so
        # sigmoid(pre) = 0.5*(tanh(0.5*pre)+1); the g columns get plain tanh.
        t = jnp.tanh(gates)
        i_g = 0.5 * (t[:, 0 * H:1 * H] + 1.0)
        f_g = 0.5 * (t[:, 1 * H:2 * H] + 1.0)
        g_g = t[:, 2 * H:3 * H]
        o_g = 0.5 * (t[:, 3 * H:4 * H] + 1.0)

        c_new = f_g * c_scr[...] + i_g * g_g                           # (2B, H)
        h_new = o_g * jnp.tanh(c_new)                                  # second EUP push

        c_scr[...] = c_new
        hpad[0:B, 0:H] = h_new[0:B]            # fw state block
        hpad[B:2 * B, H:2 * H] = h_new[B:2 * B]  # bw state block (off-blocks stay zero)

        of_ref[j] = h_new[0:B].astype(of_ref.dtype)
        ob_ref[jb] = h_new[B:2 * B].astype(ob_ref.dtype)
        return carry

    jax.lax.fori_loop(0, Tc, step, 0, unroll=unroll)


def _bilstm_layer(gi_fw, gi_bw, w_rec, t_chunk):
    """Run the fused fw+bw recurrence over the whole sequence. Returns (fw, bw), each (T, B, H)."""
    T, B, G = gi_fw.shape
    H = G // 4
    assert T % t_chunk == 0
    nc = T // t_chunk
    kernel = functools.partial(_bilstm_rec_kernel, unroll=min(t_chunk, 8))

    gi_fw_spec = pl.BlockSpec((t_chunk, B, G), lambda c: (c, 0, 0))
    gi_bw_spec = pl.BlockSpec((t_chunk, B, G), lambda c: (nc - 1 - c, 0, 0))
    w_spec = pl.BlockSpec((2 * H, G), lambda c: (0, 0))
    out_fw_spec = pl.BlockSpec((t_chunk, B, H), lambda c: (c, 0, 0))
    out_bw_spec = pl.BlockSpec((t_chunk, B, H), lambda c: (nc - 1 - c, 0, 0))

    return pl.pallas_call(
        kernel,
        grid=(nc,),
        in_specs=[gi_fw_spec, gi_bw_spec, w_spec],
        out_specs=(out_fw_spec, out_bw_spec),
        out_shape=(jax.ShapeDtypeStruct((T, B, H), jnp.float32),
                   jax.ShapeDtypeStruct((T, B, H), jnp.float32)),
        scratch_shapes=[pltpu.VMEM((2 * B, 2 * H), jnp.float32),
                        pltpu.VMEM((2 * B, H), jnp.float32)],
        compiler_params=pltpu.CompilerParams(
            dimension_semantics=("arbitrary",),   # state carried across chunks: must stay serial
            vmem_limit_bytes=_VMEM_LIMIT),
    )(gi_fw, gi_bw, w_rec)


# ------------------------------------------------------------------------- full model
def dkf_bidirectional_rnn(x, kparams, hidden_size, combine_type="concat", alpha=0.5,
                          t_chunk=None):
    """x: (B, T, input_size) -> (B, T, output_size).  Mirrors DKF_Bidirectional_RNN.forward."""
    B, T, _ = x.shape
    H = hidden_size

    if t_chunk is None:
        t_chunk = _choose_t_chunk(T, B, H)
    else:
        while T % t_chunk:
            t_chunk -= 1

    x_tm = jnp.transpose(x, (1, 0, 2)).astype(jnp.bfloat16)  # time-major once: (T, B, Din)

    fw_tm = bw_tm = None
    for li, layer in enumerate(kparams):
        if li == 0:
            x2d = x_tm.reshape(T * B, -1)
            gif2d, gib2d = _input_projection_first(
                x2d, layer["fw"]["wih"], layer["bw"]["wih"],
                layer["fw"]["bias"], layer["bw"]["bias"])
        else:
            f2d = fw_tm.reshape(T * B, H).astype(jnp.bfloat16)
            b2d = bw_tm.reshape(T * B, H).astype(jnp.bfloat16)
            gif2d, gib2d = _input_projection_deep(
                f2d, b2d,
                layer["fw"]["wih_f"], layer["fw"]["wih_b"],
                layer["bw"]["wih_f"], layer["bw"]["wih_b"],
                layer["fw"]["bias"], layer["bw"]["bias"])
        gi_fw = gif2d.reshape(T, B, 4 * H)
        gi_bw = gib2d.reshape(T, B, 4 * H)
        fw_tm, bw_tm = _bilstm_layer(gi_fw, gi_bw, layer["w_rec"], t_chunk)

    if combine_type == "concat":
        out_tm = jnp.concatenate([fw_tm, bw_tm], axis=-1)       # (T, B, 2H)
    elif combine_type == "sum":
        out_tm = fw_tm + bw_tm
    elif combine_type == "weighted_sum":
        out_tm = alpha * fw_tm + (1.0 - alpha) * bw_tm
    elif combine_type == "concat_linear":
        # TODO(synk): combine_linear weights are not part of this synthetic harness (default is 'concat').
        raise NotImplementedError("concat_linear weights not initialized in this synthetic kernel")
    else:
        raise ValueError(f"Unknown combine_type: {combine_type}")

    return jnp.transpose(out_tm, (1, 0, 2))                     # back to batch-major once


# ----------------------------------------------------------------------- param init / prep
def init_params(key, input_size, hidden_size, num_layers):
    """PyTorch-style uniform(-1/sqrt(H), 1/sqrt(H)) init, gate order i,f,g,o (canonical f32).

    Stored pre-transposed / pre-split:
      layer 0:   wih (Din, 4H)
      layer > 0: wih_f (H, 4H) [applied to fw_prev], wih_b (H, 4H) [applied to bw_prev]
      all:       whh (H, 4H), bias (1, 4H) = b_ih + b_hh
    """
    stdv = 1.0 / np.sqrt(hidden_size)
    H = hidden_size
    params = []
    for layer in range(num_layers):
        din = input_size if layer == 0 else 2 * H
        layer_p = {}
        for direction in ("fw", "bw"):
            key, k1, k2, k3, k4 = jax.random.split(key, 5)
            wih = jax.random.uniform(k1, (4 * H, din), jnp.float32, -stdv, stdv)
            whh = jax.random.uniform(k2, (4 * H, H), jnp.float32, -stdv, stdv)
            b_ih = jax.random.uniform(k3, (4 * H,), jnp.float32, -stdv, stdv)
            b_hh = jax.random.uniform(k4, (4 * H,), jnp.float32, -stdv, stdv)
            wih_T = wih.T  # (din, 4H)
            d = {"whh": whh.T, "bias": (b_ih + b_hh)[None, :]}
            if layer == 0:
                d["wih"] = wih_T
            else:
                d["wih_f"] = wih_T[:H, :]
                d["wih_b"] = wih_T[H:, :]
            layer_p[direction] = d
        params.append(layer_p)
    return params


def prep_kernel_params(params, hidden_size):
    """Kernel-side params: i/f/o gate columns pre-scaled by 0.5 (for the fused-tanh sigmoid),
    weights cast to bf16, and the two directions' W_hh stacked into one (2H, 4H) weight."""
    H = hidden_size
    s4 = jnp.concatenate([jnp.full((H,), 0.5), jnp.full((H,), 0.5),
                          jnp.ones((H,)), jnp.full((H,), 0.5)]).astype(jnp.float32)
    kparams = []
    for li, layer in enumerate(params):
        kl = {"fw": {}, "bw": {}}
        for d in ("fw", "bw"):
            p = layer[d]
            kl[d]["bias"] = (p["bias"] * s4[None, :]).astype(jnp.float32)
            if li == 0:
                kl[d]["wih"] = (p["wih"] * s4[None, :]).astype(jnp.bfloat16)
            else:
                kl[d]["wih_f"] = (p["wih_f"] * s4[None, :]).astype(jnp.bfloat16)
                kl[d]["wih_b"] = (p["wih_b"] * s4[None, :]).astype(jnp.bfloat16)
        kl["w_rec"] = jnp.concatenate(
            [layer["fw"]["whh"] * s4[None, :],
             layer["bw"]["whh"] * s4[None, :]], axis=0).astype(jnp.bfloat16)  # (2H, 4H)
        kparams.append(kl)
    return kparams


# ------------------------------------------------------------------- pure-JAX reference
def _ref_lstm_dir(x_tm, wih_T, whh_T, b, reverse, H):
    T, B, _ = x_tm.shape
    xs = x_tm[::-1] if reverse else x_tm

    def step(carry, x_t):
        h, c = carry
        gates = x_t @ wih_T + h @ whh_T + b
        i = jax.nn.sigmoid(gates[:, 0 * H:1 * H])
        f = jax.nn.sigmoid(gates[:, 1 * H:2 * H])
        g = jnp.tanh(gates[:, 2 * H:3 * H])
        o = jax.nn.sigmoid(gates[:, 3 * H:4 * H])
        c = f * c + i * g
        h = o * jnp.tanh(c)
        return (h, c), h

    init = (jnp.zeros((B, H), jnp.float32), jnp.zeros((B, H), jnp.float32))
    _, hs = jax.lax.scan(step, init, xs)
    return hs[::-1] if reverse else hs


def ref_model(x, params, H, combine_type="concat", alpha=0.5):
    h = x
    for li, layer in enumerate(params):
        x_tm = jnp.transpose(h, (1, 0, 2))
        outs = {}
        for d in ("fw", "bw"):
            p = layer[d]
            if li == 0:
                wih_T = p["wih"]
            else:
                wih_T = jnp.concatenate([p["wih_f"], p["wih_b"]], axis=0)
            outs[d] = _ref_lstm_dir(x_tm, wih_T, p["whh"], p["bias"], d == "bw", H)
        h = jnp.concatenate([jnp.transpose(outs["fw"], (1, 0, 2)),
                             jnp.transpose(outs["bw"], (1, 0, 2))], axis=-1)
    fw_out = h[:, :, :H]
    bw_out = h[:, :, H:]
    if combine_type == "concat":
        return h
    elif combine_type == "sum":
        return fw_out + bw_out
    elif combine_type == "weighted_sum":
        return alpha * fw_out + (1.0 - alpha) * bw_out
    else:
        raise ValueError(combine_type)


# --------------------------------------------------------------------------------- main
if __name__ == "__main__":
    B, T = 4, 8
    input_size, hidden_size, num_layers = 16, 32, 2
    combine_type = "concat"

    key = jax.random.PRNGKey(0)
    kx, kp = jax.random.split(key)
    x = jax.random.normal(kx, (B, T, input_size), jnp.float32)
    params = init_params(kp, input_size, hidden_size, num_layers)
    kparams = prep_kernel_params(params, hidden_size)

    out = dkf_bidirectional_rnn(x, kparams, hidden_size, combine_type)
    out = jax.block_until_ready(out)

    assert out.shape == (B, T, 2 * hidden_size), out.shape

    ref = jax.block_until_ready(ref_model(x, params, hidden_size, combine_type))
    # bf16 matmul operands (f32 accumulation) => looser tolerance vs the pure-f32 reference.
    np.testing.assert_allclose(np.asarray(out), np.asarray(ref), rtol=5e-2, atol=5e-2)

    print("KERNEL_OK")
</pallas_src>

<mosaic_0001>
module attributes {stable_mosaic.version = 11 : i64} {
  func.func @_proj1_kernel(%arg0: i32, %arg1: memref<32x16xbf16, #tpu.memory_space<vmem>>, %arg2: memref<16x128xbf16, #tpu.memory_space<vmem>>, %arg3: memref<16x128xbf16, #tpu.memory_space<vmem>>, %arg4: memref<1x128xf32, #tpu.memory_space<vmem>>, %arg5: memref<1x128xf32, #tpu.memory_space<vmem>>, %arg6: memref<32x128xbf16, #tpu.memory_space<vmem>>, %arg7: memref<32x128xbf16, #tpu.memory_space<vmem>>) attributes {dimension_semantics = [#tpu.dimension_semantics<parallel>], iteration_bounds = array<i64: 1>, scalar_prefetch = 0 : i64, scratch_operands = 0 : i64, tpu.core_type = #tpu.core_type<tc>, window_params = [{transform_indices = @transform_0, window_bounds = array<i64: 32, 16>}, {pipeline_mode = #tpu.pipeline_mode<synchronous>, transform_indices = @transform_1, window_bounds = array<i64: 16, 128>}, {pipeline_mode = #tpu.pipeline_mode<synchronous>, transform_indices = @transform_2, window_bounds = array<i64: 16, 128>}, {pipeline_mode = #tpu.pipeline_mode<synchronous>, transform_indices = @transform_3, window_bounds = array<i64: 1, 128>}, {pipeline_mode = #tpu.pipeline_mode<synchronous>, transform_indices = @transform_4, window_bounds = array<i64: 1, 128>}, {transform_indices = @transform_5, window_bounds = array<i64: 32, 128>}, {transform_indices = @transform_6, window_bounds = array<i64: 32, 128>}]} {
    %c0 = arith.constant 0 : index
    %c0_0 = arith.constant 0 : index
    %0 = vector.load %arg1[%c0, %c0_0] : memref<32x16xbf16, #tpu.memory_space<vmem>>, vector<32x16xbf16>
    %c0_1 = arith.constant 0 : index
    %c0_2 = arith.constant 0 : index
    %1 = vector.load %arg2[%c0_1, %c0_2] : memref<16x128xbf16, #tpu.memory_space<vmem>>, vector<16x128xbf16>
    %cst = arith.constant dense<0.000000e+00> : vector<32x128xf32>
    %2 = tpu.matmul %0, %1, %cst {dimension_numbers = #tpu.dot_dimension_numbers<[1], [0], [0], [1], [0, 0, 1, 1], [], []>} : vector<32x16xbf16>, vector<16x128xbf16>, vector<32x128xf32> -> vector<32x128xf32>
    %c0_3 = arith.constant 0 : index
    %c0_4 = arith.constant 0 : index
    %3 = vector.load %arg4[%c0_3, %c0_4] : memref<1x128xf32, #tpu.memory_space<vmem>>, vector<1x128xf32>
    %4 = vector.broadcast %3 : vector<1x128xf32> to vector<32x128xf32>
    %5 = arith.addf %2, %4 : vector<32x128xf32>
    %6 = arith.truncf %5 : vector<32x128xf32> to vector<32x128xbf16>
    %c0_5 = arith.constant 0 : index
    %c0_6 = arith.constant 0 : index
    %7 = vector.load %arg6[%c0_5, %c0_6] : memref<32x128xbf16, #tpu.memory_space<vmem>>, vector<32x128xbf16>
    tpu.vector_store %arg6[%c0_5, %c0_6], %6 {strides = array<i32>} : memref<32x128xbf16, #tpu.memory_space<vmem>>, vector<32x128xbf16>,
    %c0_7 = arith.constant 0 : index
    %c0_8 = arith.constant 0 : index
    %8 = vector.load %arg3[%c0_7, %c0_8] : memref<16x128xbf16, #tpu.memory_space<vmem>>, vector<16x128xbf16>
    %cst_9 = arith.constant dense<0.000000e+00> : vector<32x128xf32>
    %9 = tpu.matmul %0, %8, %cst_9 {dimension_numbers = #tpu.dot_dimension_numbers<[1], [0], [0], [1], [0, 0, 1, 1], [], []>} : vector<32x16xbf16>, vector<16x128xbf16>, vector<32x128xf32> -> vector<32x128xf32>
    %c0_10 = arith.constant 0 : index
    %c0_11 = arith.constant 0 : index
    %10 = vector.load %arg5[%c0_10, %c0_11] : memref<1x128xf32, #tpu.memory_space<vmem>>, vector<1x128xf32>
    %11 = vector.broadcast %10 : vector<1x128xf32> to vector<32x128xf32>
    %12 = arith.addf %9, %11 : vector<32x128xf32>
    %13 = arith.truncf %12 : vector<32x128xf32> to vector<32x128xbf16>
    %c0_12 = arith.constant 0 : index
    %c0_13 = arith.constant 0 : index
    %14 = vector.load %arg7[%c0_12, %c0_13] : memref<32x128xbf16, #tpu.memory_space<vmem>>, vector<32x128xbf16>
    tpu.vector_store %arg7[%c0_12, %c0_13], %13 {strides = array<i32>} : memref<32x128xbf16, #tpu.memory_space<vmem>>, vector<32x128xbf16>,
    return
  }
  func.func @transform_0(%arg0: i32) -> (i32, i32) {
    %c0_i32 = arith.constant 0 : i32
    %c0_i32_0 = arith.constant 0 : i32
    return %arg0, %c0_i32 : i32, i32
  }
  func.func @transform_1(%arg0: i32) -> (i32, i32) {
    %c0_i32 = arith.constant 0 : i32
    %c0_i32_0 = arith.constant 0 : i32
    %c0_i32_1 = arith.constant 0 : i32
    return %c0_i32, %c0_i32_0 : i32, i32
  }
  func.func @transform_2(%arg0: i32) -> (i32, i32) {
    %c0_i32 = arith.constant 0 : i32
    %c0_i32_0 = arith.constant 0 : i32
    %c0_i32_1 = arith.constant 0 : i32
    return %c0_i32, %c0_i32_0 : i32, i32
  }
  func.func @transform_3(%arg0: i32) -> (i32, i32) {
    %c0_i32 = arith.constant 0 : i32
    %c0_i32_0 = arith.constant 0 : i32
    %c0_i32_1 = arith.constant 0 : i32
    return %c0_i32, %c0_i32_0 : i32, i32
  }
  func.func @transform_4(%arg0: i32) -> (i32, i32) {
    %c0_i32 = arith.constant 0 : i32
    %c0_i32_0 = arith.constant 0 : i32
    %c0_i32_1 = arith.constant 0 : i32
    return %c0_i32, %c0_i32_0 : i32, i32
  }
  func.func @transform_5(%arg0: i32) -> (i32, i32) {
    %c0_i32 = arith.constant 0 : i32
    %c0_i32_0 = arith.constant 0 : i32
    return %arg0, %c0_i32 : i32, i32
  }
  func.func @transform_6(%arg0: i32) -> (i32, i32) {
    %c0_i32 = arith.constant 0 : i32
    %c0_i32_0 = arith.constant 0 : i32
    return %arg0, %c0_i32 : i32, i32
  }
}

</mosaic_0001>

<bundles_post_ra>
// kernel: tpu_custom_call.1
= control target key start
LH: loop header
LB: loop body
LE: loop exit
PB: predicated region body
PF: predicated region fallthrough
CT: control target
= control target key end

     0   :  { %12 = vsyncpa [#allocation3], 0  ;;  %vm54_vm0 = vcmask 130048   ;;  %s456_s0 = inlined_call_operand.vmem [shape: bf16[32,16], index: 0, kind: input, shape index: {}]   ;;  %s457_s1 = inlined_call_operand.vmem [shape: bf16[16,128], index: 1, kind: input, shape index: {}]   ;;  %s458_s2 = inlined_call_operand.vmem [shape: bf16[16,128], index: 2, kind: input, shape index: {}]   ;;  %s459_s3 = inlined_call_operand.vmem [shape: f32[1,128], index: 3, kind: input, shape index: {}]   ;;  %s460_s4 = inlined_call_operand.vmem [shape: f32[1,128], index: 4, kind: input, shape index: {}]   ;;  %s461_s5 = inlined_call_operand.hbm [shape: bf16[32,128], index: 5, kind: output, shape index: {0}]   ;;  %s462_s6 = inlined_call_operand.hbm [shape: bf16[32,128], index: 6, kind: output, shape index: {1}]  }
   0x1   :  { %v316_v0 = vld [vmem:[%s457_s1] sm:$0xff]   ;;  %v319_v3 = vld [vmem:[%s456_s0 + $0x8] sm:$0xff]  }
   0x2   :  { %v317_v1 = vld [vmem:[%s458_s2] sm:$0xff]   ;;  %300 = vmatprep.subr.bf16.mxu0 %v316_v0 }
   0x3   :  { %v318_v2 = vld [vmem:[%s456_s0] sm:$0xff]   ;;  %306 = vmatprep.subr.bf16.mxu1 %v317_v1  ;;  %301 = vmatpush3.bf16.msra.mxu0 %v316_v0 }
   0x4   :  { %307 = vmatpush3.bf16.msra.mxu1 %v317_v1  ;;  %302 = vmatprep.mubr.msk.bf16.mxu0 %vm54_vm0, %v318_v2 }
   0x5   :  { %13 = vsyncpa [#allocation5], 0  ;;  %308 = vmatprep.mubr.msk.bf16.mxu1 %vm54_vm0, %v318_v2  ;;  %v246_v5 = vld [vmem:[%s459_s3] ss:$0 sm:$0xff]  ;;  %s368_s0 = smov [#allocation2]   ;;  %s369_s3 = smov [#allocation4]  }
   0x6   :  { %303 = vmatmul.mubr.msk.bf16.vlgmr.msra.gmra.mrb[0].mxu0 %vm54_vm0, %v319_v3  ;;  %v256_v7 = vld [vmem:[%s460_s4] ss:$0 sm:$0xff]  ;;  %s219_s7 = sshll.u32 %s368_s0, 4  ;;  %s231_s8 = sshll.u32 %s369_s3, 4  ;;  %s220_s7 = int_to_ptr.vmem [resolvable:$true] %s219_s7  ;;  %s425_s8 = int_to_ptr.vmem [resolvable:$true] %s231_s8 }
   0x7   :  { %309 = vmatmul.mubr.msk.bf16.vlgmr.msra.gmra.mrb[0].mxu1 %vm54_vm0, %v319_v3  ;;  %s320_s4 = scalar_lea.vmem %s220_s7, 256  ;;  %p325_p1 = scmp.lt.s32.totalorder %s220_s7, %s220_s7 }
   0x8   :  { %p321_p0 = scmp.ne.s32.totalorder %s220_s7, %s320_s4  ;;  %p326_p2 = scmp.lt.s32.totalorder %s320_s4, %s320_s4 }
   0xa   :  { %p327_p3 = por %p326_p2, %p325_p1 }
   0xc   :  { %p328_p4 = pnand %p327_p3, %p321_p0 }
  0xd9   :  { %v304_v4 = vpop.f32.mrb[0].mxu0 }
  0xda   :  { %v310_v6 = vpop.f32.mrb[0].mxu1  ;;  %v95_v8 = vpop.f32.mrb[1].mxu0  ;;  %v104_v11 = vadd.f32 %v304_v4, %v246_v5 }
  0xdb   :  { %v179_v9 = vpop.f32.mrb[1].mxu1  ;;  %v305_v10 = vpop.f32.mrb[2].mxu0  ;;  %v188_v15 = vadd.f32 %v310_v6, %v256_v7  ;;  %v96_v16 = vadd.f32 %v246_v5, %v95_v8 }
  0xdc   :  { %v107_v12 = vadd.f32 %v305_v10, %v246_v5  ;;  %v311_v13 = vpop.f32.mrb[2].mxu1  ;;  %v98_v14 = vpop.f32.mrb[3].mxu0  ;;  %v180_v20 = vadd.f32 %v256_v7, %v179_v9 }
  0xdd   :  { %v191_v17 = vadd.f32 %v311_v13, %v256_v7  ;;  %v99_v18 = vadd.f32 %v246_v5, %v98_v14  ;;  %v182_v19 = vpop.f32.mrb[3].mxu1 }
  0xde   :  { %v280_v21 = vpack.c.bf16 %v107_v12, %v104_v11  ;;  %v183_v22 = vadd.f32 %v256_v7, %v182_v19 }
  0xdf   :  { %v290_v23 = vpack.c.bf16 %v191_v17, %v188_v15  ;;  %v275_v24 = vpack.c.bf16 %v99_v18, %v96_v16 }
  0xe0   :  { %292 = vst [vmem:[#allocation2 + $0x8] sm:$0xff] %v280_v21   ;;  %v285_v25 = vpack.c.bf16 %v183_v22, %v180_v20 }
  0xe1   :  { %293 = vst [vmem:[#allocation4 + $0x8] sm:$0xff] %v290_v23   ;;  %276 = vst [vmem:[#allocation2] sm:$0xff] %v275_v24  }
  0xe2   :  { %286 = vst [vmem:[#allocation4] sm:$0xff] %v285_v25  }
  0xe3   :  { %331 = shalt.err (!%p328_p4)
}
  0xe4   :  { %s332_s11 = scalar_lea.hbm %s461_s5, 256 }
  0xe5   :  { %p333_p5 = scmp.ne.s32.totalorder %s461_s5, %s332_s11  ;;  %p336_p6 = scmp.lt.u32.totalorder %s332_s11, %s461_s5 }
  0xe7   :  { %p338_p7 = pnand %p336_p6, %p333_p5 }
  0xe9   :  { %341 = shalt.err (!%p338_p7)
}
  0xea   :  { %s370_s16 = smov 64   ;;  %s371_s17 = smov 4  }
  0xeb   :  { %225 = dma.vmem_to_hbm [thread:$0]  %s220_s7, 256, %s461_s5, [#allocation3], %s370_s16, %s370_s16, %s371_s17  }
  0xec   :  { %s342_s20 = scalar_lea.vmem %s425_s8, 256  ;;  %p347_p9 = scmp.lt.s32.totalorder %s425_s8, %s425_s8 }
  0xed   :  { %p343_p8 = scmp.ne.s32.totalorder %s425_s8, %s342_s20  ;;  %p348_p10 = scmp.lt.s32.totalorder %s342_s20, %s342_s20 }
  0xef   :  { %p349_p11 = por %p348_p10, %p347_p9 }
  0xf1   :  { %p350_p12 = pnand %p349_p11, %p343_p8 }
  0xf3   :  { %353 = shalt.err (!%p350_p12)
}
  0xf4   :  { %s354_s23 = scalar_lea.hbm %s462_s6, 256 }
  0xf5   :  { %p355_p13 = scmp.ne.s32.totalorder %s462_s6, %s354_s23  ;;  %p358_p0 = scmp.lt.u32.totalorder %s354_s23, %s462_s6 }
  0xf7   :  { %p360_p1 = pnand %p358_p0, %p355_p13 }
  0xf9   :  { %363 = shalt.err (!%p360_p1)
}
  0xfa   :  { %237 = dma.vmem_to_hbm [thread:$0]  %s425_s8, 256, %s462_s6, [#allocation5], %s370_s16, %s370_s16, %s371_s17  }
  0xfb   :  { %364 = dma.done.wait [#allocation3], 256  }
  0xfc   :  { %365 = vsyncadd [#allocation3], 4294967040 }
  0xfd   :  { %366 = dma.done.wait [#allocation5], 256  }
  0xfe   :  { %367 = vsyncadd [#allocation5], 4294967040 }
  0xff   :  { %244 = vsyncpa [#allocation3], 1 }
 0x100   :  { %245 = vsyncpa [#allocation5], 1 }

</bundles_post_ra>
